<compile_context>
chip_gen: v7x
topology: tpu7x:2x2x1
jax: 0.10.0
libtpu: 0.0.40
codegen_flags: <defaults>
</compile_context>

<pallas_src>
import functools

import jax
import jax.numpy as jnp
from jax.experimental import pallas as pl
from jax.experimental.pallas import tpu as pltpu

_LANES = 128


def _round_up(x, m):
    return (x + m - 1) // m * m


def _tensorcores_per_chip():
    """Best-effort TensorCore count per chip (v7x: 2, earlier gens: 1)."""
    try:
        kind = (jax.devices()[0].device_kind or "").lower()
    except Exception:
        return 1
    return 2 if ("v7" in kind or "7x" in kind) else 1


def _sigmoid(x):
    # 0.5*(tanh(x/2)+1): a single EUP push per element (vs exp + reciprocal),
    # which keeps the kernel HBM-bound on v7x where EUP saturates first.
    return 0.5 * (jnp.tanh(0.5 * x) + 1.0)


def _dice_partial_kernel(x_ref, t_ref, inter_ref, xs_ref, ts_ref,
                         inter_acc, xs_acc, ts_acc,
                         *, f_valid, steps, block_feats, needs_mask):
    s = pl.program_id(0)          # split axis (v7x: one split per TensorCore)
    k = pl.program_id(1)          # reduction step within the split

    @pl.when(k == 0)
    def _init():
        inter_acc[...] = jnp.zeros_like(inter_acc)
        xs_acc[...] = jnp.zeros_like(xs_acc)
        ts_acc[...] = jnp.zeros_like(ts_acc)

    # First flat feature index covered by this *logical* block (un-clamped,
    # so clamped duplicate blocks from split rounding mask to zero).
    feat0 = (s * steps + k) * block_feats

    def _accumulate(mask):
        # Streaming body: upcast -> sigmoid -> (optional select-mask) ->
        # partial sums into small resident f32 accumulators.  Kept straight-
        # line so Mosaic can fuse it into one pass over the block.
        x = _sigmoid(x_ref[...].astype(jnp.float32))
        t = t_ref[...].astype(jnp.float32)
        if mask is not None:
            # jnp.where is a select: NaN/garbage from overhang reads cannot
            # propagate into the sums.
            x = jnp.where(mask, x, 0.0)
            t = jnp.where(mask, t, 0.0)
        if x.ndim == 3:
            # Aligned layout (B, rows, 128): row reduce only, the lane
            # reduce is deferred to the wrapper epilogue.
            inter_acc[...] += jnp.sum(x * t, axis=1)
            xs_acc[...] += jnp.sum(x, axis=1)
            ts_acc[...] += jnp.sum(t, axis=1)
        else:
            # Ragged layout (B, cols): fold lanes into (B, 1) partials.
            inter_acc[...] += jnp.sum(x * t, axis=1, keepdims=True)
            xs_acc[...] += jnp.sum(x, axis=1, keepdims=True)
            ts_acc[...] += jnp.sum(t, axis=1, keepdims=True)

    if needs_mask:
        # Gate the mask work: only blocks that overhang the valid feature
        # range (ragged tail / split-rounding duplicates) pay for the iotas,
        # compare and selects.  Interior blocks run the plain path.
        overhangs = feat0 + block_feats > f_valid
        interior = feat0 + block_feats <= f_valid

        @pl.when(overhangs)
        def _masked():
            shp = x_ref.shape
            if len(shp) == 3:
                rows = shp[1]
                ridx = jax.lax.broadcasted_iota(jnp.int32, (rows, _LANES), 0)
                lidx = jax.lax.broadcasted_iota(jnp.int32, (rows, _LANES), 1)
                mask = ((feat0 + ridx * _LANES + lidx) < f_valid)[None]
            else:
                cols = shp[1]
                cidx = jax.lax.broadcasted_iota(jnp.int32, (1, cols), 1)
                mask = (feat0 + cidx) < f_valid
            _accumulate(mask)

        @pl.when(interior)
        def _plain():
            _accumulate(None)
    else:
        _accumulate(None)

    @pl.when(k == pl.num_programs(1) - 1)
    def _finalize():
        inter_ref[...] = inter_acc[...][None]
        xs_ref[...] = xs_acc[...][None]
        ts_ref[...] = ts_acc[...][None]


def batch_dice_loss(inputs, targets, smooth=1e-5, *,
                    target_block_bytes=None, num_splits=None):
    """Pallas equivalent of BatchDiceLoss.forward. Returns a scalar float32.

    Targets may be any dtype (bf16/int8 recommended for 0/1 masks); all
    upcasting is done inside the kernel to keep HBM traffic minimal.
    """
    assert inputs.shape == targets.shape, (
        "The dimensions of inputs and targets must match.")
    B = inputs.shape[0]
    x = inputs.reshape(B, -1)
    t = targets.reshape(B, -1)
    F = x.shape[1]

    n_tc = _tensorcores_per_chip()
    if target_block_bytes is None:
        # ~4 MiB/input on v5e/v6e, 6 MiB on v7x (faster HBM finishes a step
        # sooner, so amortize the fixed per-step cost over a larger block).
        target_block_bytes = (6 if n_tc > 1 else 4) * 1024 * 1024
    if num_splits is None:
        # One split per TensorCore; splitting on a single-TC chip is pure
        # overhead for an HBM-bound reduction.
        num_splits = n_tc

    itemsize = max(x.dtype.itemsize, t.dtype.itemsize)
    aligned = (F % _LANES == 0) and F > 0

    if aligned:
        # Zero-copy lane/sublane-dense view (B, R, 128).
        R = F // _LANES
        rows_target = max(
            8, (target_block_bytes // (B * _LANES * itemsize)) // 8 * 8)
        block_rows = R if R <= rows_target else rows_target
        n_blocks = pl.cdiv(R, block_rows)
        ops = (x.reshape(B, R, _LANES), t.reshape(B, R, _LANES))
        block_shape = (B, block_rows, _LANES)
        block_feats = block_rows * _LANES
        lane_out = _LANES
        covered = n_blocks * block_rows == R
        block_elems = B * _round_up(block_rows, 8) * _LANES       # VMEM footprint
    else:
        # Ragged feature count: run zero-copy on the 2-D (B, F) view with a
        # lane-aligned block (no full-array jnp.pad, which would cost a full
        # extra read+write of the tensor in HBM).  Block sized by VMEM
        # footprint (B pads to 8 sublanes).
        cols_target = max(
            _LANES,
            (target_block_bytes // (_round_up(B, 8) * itemsize))
            // _LANES * _LANES)
        block_cols = min(cols_target, _round_up(F, _LANES))
        n_blocks = pl.cdiv(F, block_cols)
        ops = (x, t)
        block_shape = (B, block_cols)
        block_feats = block_cols
        lane_out = 1
        covered = n_blocks * block_cols == F
        block_elems = _round_up(B, 8) * block_cols                # VMEM footprint

    num_splits = max(1, min(int(num_splits), n_blocks))
    steps = pl.cdiv(n_blocks, num_splits)
    needs_mask = (not covered) or (num_splits * steps != n_blocks)

    ndim = len(block_shape)

    def in_map(s, k):
        # Clamp logical blocks past the end (split rounding) onto the last
        # real block; the in-kernel mask zeroes their contribution.
        blk = jnp.minimum(s * steps + k, n_blocks - 1)
        return (0, blk, 0) if ndim == 3 else (0, blk)

    kernel = functools.partial(
        _dice_partial_kernel, f_valid=F, steps=steps,
        block_feats=block_feats, needs_mask=needs_mask)

    out_spec = pl.BlockSpec((1, B, lane_out), lambda s, k: (s, 0, 0))
    out_shape = jax.ShapeDtypeStruct((num_splits, B, lane_out), jnp.float32)

    # Scoped-VMEM budget: x/t blocks x 2 pipeline buffers plus headroom for
    # f32 intermediates of the streaming body.  Explicit so v5e's 16 MiB
    # scoped default can't silently limit/fail with 4 MiB+ blocks; the cap
    # stays under v7x's 64 MiB physical VMEM per TensorCore.
    xb = block_elems * ops[0].dtype.itemsize
    tb = block_elems * ops[1].dtype.itemsize
    fb = block_elems * 4
    vmem_limit = int(min(56 << 20,
                         max(16 << 20, 2 * (xb + tb) + 2 * fb + (4 << 20))))

    if num_splits > 1 and n_tc > 1:
        dim0 = pltpu.CORE_PARALLEL        # actually shard splits across v7x TCs
    elif num_splits > 1:
        dim0 = pltpu.PARALLEL             # neutral on single-TC chips
    else:
        dim0 = pltpu.ARBITRARY

    inter_p, xs_p, ts_p = pl.pallas_call(
        kernel,
        out_shape=(out_shape, out_shape, out_shape),
        grid_spec=pltpu.PrefetchScalarGridSpec(
            num_scalar_prefetch=0,
            grid=(num_splits, steps),
            in_specs=[pl.BlockSpec(block_shape, in_map),
                      pl.BlockSpec(block_shape, in_map)],
            out_specs=[out_spec, out_spec, out_spec],
            scratch_shapes=[
                pltpu.VMEM((B, lane_out), jnp.float32),  # intersection partials
                pltpu.VMEM((B, lane_out), jnp.float32),  # sigmoid(x) partials
                pltpu.VMEM((B, lane_out), jnp.float32),  # target partials
            ],
        ),
        compiler_params=pltpu.CompilerParams(
            dimension_semantics=(dim0, pltpu.ARBITRARY),
            vmem_limit_bytes=vmem_limit,
        ),
    )(*ops)

    # Tiny epilogue (O(B) work): combine split/lane partials, dice, batch mean.
    inter = jnp.sum(inter_p, axis=(0, 2))
    xs = jnp.sum(xs_p, axis=(0, 2))
    ts = jnp.sum(ts_p, axis=(0, 2))
    dice = (2.0 * inter + smooth) / (xs + ts + smooth)
    return jnp.mean(1.0 - dice)


def _reference(inputs, targets, smooth=1e-5):
    B = inputs.shape[0]
    x = jax.nn.sigmoid(inputs.astype(jnp.float32)).reshape(B, -1)
    t = targets.astype(jnp.float32).reshape(B, -1)
    inter = jnp.sum(x * t, axis=1)
    dice = (2.0 * inter + smooth) / (
        jnp.sum(x, axis=1) + jnp.sum(t, axis=1) + smooth)
    return jnp.mean(1.0 - dice)


if __name__ == "__main__":
    key = jax.random.PRNGKey(0)
    k1, k2, k3, k4, k5, k6 = jax.random.split(key, 6)

    # Case 1: NCHW, 128-aligned features (single block, no mask).  Binary
    # masks as bf16: exact for 0/1 and halves the target HBM stream.
    B, C, H, W = 2, 4, 16, 16                      # F = 1024
    inputs = jax.random.normal(k1, (B, C, H, W), dtype=jnp.float32)
    targets = (jax.random.uniform(k2, (B, C, H, W)) > 0.5).astype(jnp.bfloat16)
    loss = jax.block_until_ready(batch_dice_loss(inputs, targets))
    ref = _reference(inputs, targets)
    assert jnp.allclose(loss, ref, atol=1e-5, rtol=1e-5), (loss, ref)

    # Case 2: ragged features (F = 3*37*37 = 4107) -> zero-copy 2-D path.
    # Tiny block budget + forced 2 splits exercises multi-block iteration,
    # split rounding (clamped fully-masked block) and the gated tail mask.
    inputs2 = jax.random.normal(k3, (2, 3, 37, 37), dtype=jnp.float32)
    targets2 = (jax.random.uniform(k4, (2, 3, 37, 37)) > 0.5).astype(jnp.bfloat16)
    loss2 = jax.block_until_ready(
        batch_dice_loss(inputs2, targets2, target_block_bytes=8192,
                        num_splits=2))
    ref2 = _reference(inputs2, targets2)
    assert jnp.allclose(loss2, ref2, atol=1e-5, rtol=1e-5), (loss2, ref2)

    # Case 3: 128-aligned (F = 3*32*40 = 3840, R = 30) with block_rows = 8 so
    # the last block overhangs rows -> exercises the gated mask on the
    # aligned 3-D path, f32 targets for dtype coverage.
    inputs3 = jax.random.normal(k5, (2, 3, 32, 40), dtype=jnp.float32)
    targets3 = (jax.random.uniform(k6, (2, 3, 32, 40)) > 0.5).astype(jnp.float32)
    loss3 = jax.block_until_ready(
        batch_dice_loss(inputs3, targets3, target_block_bytes=8192))
    ref3 = _reference(inputs3, targets3)
    assert jnp.allclose(loss3, ref3, atol=1e-5, rtol=1e-5), (loss3, ref3)

    print("KERNEL_OK")
</pallas_src>

<mosaic_0001>
module attributes {stable_mosaic.version = 11 : i64} {
  func.func @_dice_partial_kernel(%arg0: i32, %arg1: i32, %arg2: memref<2x8x128xf32, #tpu.memory_space<vmem>>, %arg3: memref<2x8x128xbf16, #tpu.memory_space<vmem>>, %arg4: memref<1x2x128xf32, #tpu.memory_space<vmem>>, %arg5: memref<1x2x128xf32, #tpu.memory_space<vmem>>, %arg6: memref<1x2x128xf32, #tpu.memory_space<vmem>>, %arg7: memref<2x128xf32, #tpu.memory_space<vmem>>, %arg8: memref<2x128xf32, #tpu.memory_space<vmem>>, %arg9: memref<2x128xf32, #tpu.memory_space<vmem>>) attributes {dimension_semantics = [#tpu.dimension_semantics<arbitrary>, #tpu.dimension_semantics<arbitrary>], iteration_bounds = array<i64: 1, 1>, scalar_prefetch = 0 : i64, scratch_operands = 3 : i64, tpu.core_type = #tpu.core_type<tc>, window_params = [{transform_indices = @transform_0, window_bounds = array<i64: 2, 8, 128>}, {transform_indices = @transform_1, window_bounds = array<i64: 2, 8, 128>}, {transform_indices = @transform_2, window_bounds = array<i64: 1, 2, 128>}, {transform_indices = @transform_3, window_bounds = array<i64: 1, 2, 128>}, {transform_indices = @transform_4, window_bounds = array<i64: 1, 2, 128>}]} {
    %c0_i32 = arith.constant 0 : i32
    %0 = arith.cmpi eq, %arg1, %c0_i32 : i32
    %1 = arith.extui %0 : i1 to i32
    %c0_i32_0 = arith.constant 0 : i32
    %2 = arith.cmpi ne, %1, %c0_i32_0 : i32
    scf.if %2 {
      %cst_25 = arith.constant 0.000000e+00 : f32
      %29 = vector.broadcast %cst_25 : f32 to vector<2x128xf32>
      %c0_26 = arith.constant 0 : index
      %c0_27 = arith.constant 0 : index
      %30 = vector.load %arg7[%c0_26, %c0_27] : memref<2x128xf32, #tpu.memory_space<vmem>>, vector<2x128xf32>
      tpu.vector_store %arg7[%c0_26, %c0_27], %29 {strides = array<i32>} : memref<2x128xf32, #tpu.memory_space<vmem>>, vector<2x128xf32>,
      %cst_28 = arith.constant 0.000000e+00 : f32
      %31 = vector.broadcast %cst_28 : f32 to vector<2x128xf32>
      %c0_29 = arith.constant 0 : index
      %c0_30 = arith.constant 0 : index
      %32 = vector.load %arg8[%c0_29, %c0_30] : memref<2x128xf32, #tpu.memory_space<vmem>>, vector<2x128xf32>
      tpu.vector_store %arg8[%c0_29, %c0_30], %31 {strides = array<i32>} : memref<2x128xf32, #tpu.memory_space<vmem>>, vector<2x128xf32>,
      %cst_31 = arith.constant 0.000000e+00 : f32
      %33 = vector.broadcast %cst_31 : f32 to vector<2x128xf32>
      %c0_32 = arith.constant 0 : index
      %c0_33 = arith.constant 0 : index
      %34 = vector.load %arg9[%c0_32, %c0_33] : memref<2x128xf32, #tpu.memory_space<vmem>>, vector<2x128xf32>
      tpu.vector_store %arg9[%c0_32, %c0_33], %33 {strides = array<i32>} : memref<2x128xf32, #tpu.memory_space<vmem>>, vector<2x128xf32>,
    } else {
    }
    %c0 = arith.constant 0 : index
    %c0_1 = arith.constant 0 : index
    %c0_2 = arith.constant 0 : index
    %3 = vector.load %arg2[%c0, %c0_1, %c0_2] : memref<2x8x128xf32, #tpu.memory_space<vmem>>, vector<2x8x128xf32>
    %cst = arith.constant 5.000000e-01 : f32
    %4 = vector.broadcast %cst : f32 to vector<2x8x128xf32>
    %5 = arith.mulf %4, %3 : vector<2x8x128xf32>
    %6 = math.tanh %5 : vector<2x8x128xf32>
    %cst_3 = arith.constant 1.000000e+00 : f32
    %7 = vector.broadcast %cst_3 : f32 to vector<2x8x128xf32>
    %8 = arith.addf %6, %7 : vector<2x8x128xf32>
    %cst_4 = arith.constant 5.000000e-01 : f32
    %9 = vector.broadcast %cst_4 : f32 to vector<2x8x128xf32>
    %10 = arith.mulf %9, %8 : vector<2x8x128xf32>
    %c0_5 = arith.constant 0 : index
    %c0_6 = arith.constant 0 : index
    %c0_7 = arith.constant 0 : index
    %11 = vector.load %arg3[%c0_5, %c0_6, %c0_7] : memref<2x8x128xbf16, #tpu.memory_space<vmem>>, vector<2x8x128xbf16>
    %12 = arith.extf %11 : vector<2x8x128xbf16> to vector<2x8x128xf32>
    %c0_8 = arith.constant 0 : index
    %c0_9 = arith.constant 0 : index
    %13 = vector.load %arg7[%c0_8, %c0_9] : memref<2x128xf32, #tpu.memory_space<vmem>>, vector<2x128xf32>
    %14 = arith.mulf %10, %12 : vector<2x8x128xf32>
    %cst_10 = arith.constant dense<0.000000e+00> : vector<2x128xf32>
    %15 = vector.multi_reduction <add>, %14, %cst_10 [1] : vector<2x8x128xf32> to vector<2x128xf32>
    %16 = arith.addf %13, %15 : vector<2x128xf32>
    %c0_11 = arith.constant 0 : index
    %c0_12 = arith.constant 0 : index
    %17 = vector.load %arg7[%c0_11, %c0_12] : memref<2x128xf32, #tpu.memory_space<vmem>>, vector<2x128xf32>
    tpu.vector_store %arg7[%c0_11, %c0_12], %16 {strides = array<i32>} : memref<2x128xf32, #tpu.memory_space<vmem>>, vector<2x128xf32>,
    %c0_13 = arith.constant 0 : index
    %c0_14 = arith.constant 0 : index
    %18 = vector.load %arg8[%c0_13, %c0_14] : memref<2x128xf32, #tpu.memory_space<vmem>>, vector<2x128xf32>
    %cst_15 = arith.constant dense<0.000000e+00> : vector<2x128xf32>
    %19 = vector.multi_reduction <add>, %10, %cst_15 [1] : vector<2x8x128xf32> to vector<2x128xf32>
    %20 = arith.addf %18, %19 : vector<2x128xf32>
    %c0_16 = arith.constant 0 : index
    %c0_17 = arith.constant 0 : index
    %21 = vector.load %arg8[%c0_16, %c0_17] : memref<2x128xf32, #tpu.memory_space<vmem>>, vector<2x128xf32>
    tpu.vector_store %arg8[%c0_16, %c0_17], %20 {strides = array<i32>} : memref<2x128xf32, #tpu.memory_space<vmem>>, vector<2x128xf32>,
    %c0_18 = arith.constant 0 : index
    %c0_19 = arith.constant 0 : index
    %22 = vector.load %arg9[%c0_18, %c0_19] : memref<2x128xf32, #tpu.memory_space<vmem>>, vector<2x128xf32>
    %cst_20 = arith.constant dense<0.000000e+00> : vector<2x128xf32>
    %23 = vector.multi_reduction <add>, %12, %cst_20 [1] : vector<2x8x128xf32> to vector<2x128xf32>
    %24 = arith.addf %22, %23 : vector<2x128xf32>
    %c0_21 = arith.constant 0 : index
    %c0_22 = arith.constant 0 : index
    %25 = vector.load %arg9[%c0_21, %c0_22] : memref<2x128xf32, #tpu.memory_space<vmem>>, vector<2x128xf32>
    tpu.vector_store %arg9[%c0_21, %c0_22], %24 {strides = array<i32>} : memref<2x128xf32, #tpu.memory_space<vmem>>, vector<2x128xf32>,
    %c0_i32_23 = arith.constant 0 : i32
    %26 = arith.cmpi eq, %arg1, %c0_i32_23 : i32
    %27 = arith.extui %26 : i1 to i32
    %c0_i32_24 = arith.constant 0 : i32
    %28 = arith.cmpi ne, %27, %c0_i32_24 : i32
    scf.if %28 {
      %c0_25 = arith.constant 0 : index
      %c0_26 = arith.constant 0 : index
      %29 = vector.load %arg7[%c0_25, %c0_26] : memref<2x128xf32, #tpu.memory_space<vmem>>, vector<2x128xf32>
      %30 = vector.shape_cast %29 : vector<2x128xf32> to vector<1x2x128xf32>
      %c0_27 = arith.constant 0 : index
      %c0_28 = arith.constant 0 : index
      %c0_29 = arith.constant 0 : index
      %31 = vector.load %arg4[%c0_27, %c0_28, %c0_29] : memref<1x2x128xf32, #tpu.memory_space<vmem>>, vector<1x2x128xf32>
      tpu.vector_store %arg4[%c0_27, %c0_28, %c0_29], %30 {strides = array<i32>} : memref<1x2x128xf32, #tpu.memory_space<vmem>>, vector<1x2x128xf32>,
      %c0_30 = arith.constant 0 : index
      %c0_31 = arith.constant 0 : index
      %32 = vector.load %arg8[%c0_30, %c0_31] : memref<2x128xf32, #tpu.memory_space<vmem>>, vector<2x128xf32>
      %33 = vector.shape_cast %32 : vector<2x128xf32> to vector<1x2x128xf32>
      %c0_32 = arith.constant 0 : index
      %c0_33 = arith.constant 0 : index
      %c0_34 = arith.constant 0 : index
      %34 = vector.load %arg5[%c0_32, %c0_33, %c0_34] : memref<1x2x128xf32, #tpu.memory_space<vmem>>, vector<1x2x128xf32>
      tpu.vector_store %arg5[%c0_32, %c0_33, %c0_34], %33 {strides = array<i32>} : memref<1x2x128xf32, #tpu.memory_space<vmem>>, vector<1x2x128xf32>,
      %c0_35 = arith.constant 0 : index
      %c0_36 = arith.constant 0 : index
      %35 = vector.load %arg9[%c0_35, %c0_36] : memref<2x128xf32, #tpu.memory_space<vmem>>, vector<2x128xf32>
      %36 = vector.shape_cast %35 : vector<2x128xf32> to vector<1x2x128xf32>
      %c0_37 = arith.constant 0 : index
      %c0_38 = arith.constant 0 : index
      %c0_39 = arith.constant 0 : index
      %37 = vector.load %arg6[%c0_37, %c0_38, %c0_39] : memref<1x2x128xf32, #tpu.memory_space<vmem>>, vector<1x2x128xf32>
      tpu.vector_store %arg6[%c0_37, %c0_38, %c0_39], %36 {strides = array<i32>} : memref<1x2x128xf32, #tpu.memory_space<vmem>>, vector<1x2x128xf32>,
    } else {
    }
    return
  }
  func.func @transform_0(%arg0: i32, %arg1: i32) -> (i32, i32, i32) {
    %c1_i32 = arith.constant 1 : i32
    %0 = arith.muli %arg0, %c1_i32 : i32
    %1 = arith.addi %0, %arg1 : i32
    %c0_i32 = arith.constant 0 : i32
    %2 = arith.minsi %1, %c0_i32 : i32
    %c0_i32_0 = arith.constant 0 : i32
    %c0_i32_1 = arith.constant 0 : i32
    %c0_i32_2 = arith.constant 0 : i32
    return %c0_i32_0, %2, %c0_i32_1 : i32, i32, i32
  }
  func.func @transform_1(%arg0: i32, %arg1: i32) -> (i32, i32, i32) {
    %c1_i32 = arith.constant 1 : i32
    %0 = arith.muli %arg0, %c1_i32 : i32
    %1 = arith.addi %0, %arg1 : i32
    %c0_i32 = arith.constant 0 : i32
    %2 = arith.minsi %1, %c0_i32 : i32
    %c0_i32_0 = arith.constant 0 : i32
    %c0_i32_1 = arith.constant 0 : i32
    %c0_i32_2 = arith.constant 0 : i32
    return %c0_i32_0, %2, %c0_i32_1 : i32, i32, i32
  }
  func.func @transform_2(%arg0: i32, %arg1: i32) -> (i32, i32, i32) {
    %c0_i32 = arith.constant 0 : i32
    %c0_i32_0 = arith.constant 0 : i32
    %c0_i32_1 = arith.constant 0 : i32
    return %arg0, %c0_i32, %c0_i32_0 : i32, i32, i32
  }
  func.func @transform_3(%arg0: i32, %arg1: i32) -> (i32, i32, i32) {
    %c0_i32 = arith.constant 0 : i32
    %c0_i32_0 = arith.constant 0 : i32
    %c0_i32_1 = arith.constant 0 : i32
    return %arg0, %c0_i32, %c0_i32_0 : i32, i32, i32
  }
  func.func @transform_4(%arg0: i32, %arg1: i32) -> (i32, i32, i32) {
    %c0_i32 = arith.constant 0 : i32
    %c0_i32_0 = arith.constant 0 : i32
    %c0_i32_1 = arith.constant 0 : i32
    return %arg0, %c0_i32, %c0_i32_0 : i32, i32, i32
  }
}

</mosaic_0001>

<bundles_post_ra>
// kernel: tpu_custom_call.1
= control target key start
LH: loop header
LB: loop body
LE: loop exit
PB: predicated region body
PF: predicated region fallthrough
CT: control target
= control target key end

     0   :  { %10 = vsyncpa [#allocation6], 0  ;;  %s445_s0 = inlined_call_operand.hbm [shape: f32[2,8,128], index: 0, kind: input, shape index: {}]   ;;  %s446_s1 = inlined_call_operand.hbm [shape: bf16[2,8,128], index: 1, kind: input, shape index: {}]   ;;  %s447_s2 = inlined_call_operand.hbm [shape: f32[1,2,128], index: 2, kind: output, shape index: {0}]   ;;  %s448_s3 = inlined_call_operand.hbm [shape: f32[1,2,128], index: 3, kind: output, shape index: {1}]   ;;  %s449_s4 = inlined_call_operand.hbm [shape: f32[1,2,128], index: 4, kind: output, shape index: {2}]  }
   0x1   :  { %11 = vsyncpa [#allocation9], 0 }
   0x2   :  { %12 = vsyncpa [#allocation7], 0 }
   0x3   :  { %13 = vsyncpa [#allocation12], 0  ;;  %s333_s15 = smov [#allocation5]   ;;  %s215_s19 = scalar_lea.hbm %s445_s0, 256 }
   0x4   :  { %s24_s16 = sshll.u32 %s333_s15, 4  ;;  %p216_p0 = scmp.ne.s32.totalorder %s445_s0, %s215_s19  ;;  %s25_s16 = int_to_ptr.vmem [resolvable:$true] %s24_s16 }
   0x5   :  { %p219_p1 = scmp.lt.u32.totalorder %s215_s19, %s445_s0 }
   0x7   :  { %p221_p2 = pnand %p219_p1, %p216_p0 }
   0x9   :  { %224 = shalt.err (!%p221_p2)
}
   0xa   :  { %s225_s24 = scalar_lea.vmem %s25_s16, 256  ;;  %p230_p4 = scmp.lt.s32.totalorder %s25_s16, %s25_s16 }
   0xb   :  { %p226_p3 = scmp.ne.s32.totalorder %s25_s16, %s225_s24  ;;  %p231_p5 = scmp.lt.s32.totalorder %s225_s24, %s225_s24 }
   0xd   :  { %p232_p6 = por %p231_p5, %p230_p4 }
   0xf   :  { %p233_p7 = pnand %p232_p6, %p226_p3 }
  0x11   :  { %236 = shalt.err (!%p233_p7)
}
  0x12   :  { %s334_s25 = smov 128   ;;  %s335_s26 = smov 8  }
  0x13   :  { %30 = dma.hbm_to_vmem [thread:$0]  %s445_s0, 256, %s25_s16, [#allocation6], %s334_s25, %s334_s25, %s335_s26  }
  0x14   :  { %s336_s29 = smov [#allocation8]   ;;  %s237_s7 = scalar_lea.hbm %s446_s1, 128 }
  0x15   :  { %s41_s30 = sshll.u32 %s336_s29, 4  ;;  %p238_p8 = scmp.ne.s32.totalorder %s446_s1, %s237_s7  ;;  %s42_s30 = int_to_ptr.vmem [resolvable:$true] %s41_s30 }
  0x16   :  { %p241_p9 = scmp.lt.u32.totalorder %s237_s7, %s446_s1 }
  0x18   :  { %p243_p10 = pnand %p241_p9, %p238_p8 }
  0x1a   :  { %246 = shalt.err (!%p243_p10)
}
  0x1b   :  { %s247_s12 = scalar_lea.vmem %s42_s30, 128  ;;  %p252_p12 = scmp.lt.s32.totalorder %s42_s30, %s42_s30 }
  0x1c   :  { %p248_p11 = scmp.ne.s32.totalorder %s42_s30, %s247_s12  ;;  %p253_p13 = scmp.lt.s32.totalorder %s247_s12, %s247_s12 }
  0x1e   :  { %p254_p0 = por %p253_p13, %p252_p12 }
  0x20   :  { %p255_p1 = pnand %p254_p0, %p248_p11 }
  0x22   :  { %258 = shalt.err (!%p255_p1)
}
  0x23   :  { %s337_s0 = smov 64   ;;  %s338_s13 = smov 4  }
  0x24   :  { %47 = dma.hbm_to_vmem [thread:$0]  %s446_s1, 128, %s42_s30, [#allocation9], %s337_s0, %s337_s0, %s338_s13  }
  0x25   :  { %325 = dma.done.wait [#allocation6], 256  }
  0x26   :  { %326 = vsyncadd [#allocation6], 4294967040 }
  0x27   :  { %327 = dma.done.wait [#allocation9], 128  }
  0x28   :  { %328 = vsyncadd [#allocation9], 4294967168  ;;  %v339_v0 = vmov 0.0   ;;  %v67_v1 = vld [vmem:[#allocation5] sm:$0xff]  ;;  %v68_v2 = vld [vmem:[#allocation5 + $0x8] sm:$0xff]  ;;  %vm98_vm0 = vcmask 1041409  }
  0x29   :  { %65 = vst [vmem:[#allocation3] sm:$0x3] %v339_v0  ;;  %64 = vst [vmem:[#allocation2] sm:$0x3] %v339_v0  ;;  %v198_v3 = vld [vmem:[#allocation8] sm:$0xff]   ;;  %v69_v4 = vmul.f32 0.5, %v67_v1 }
  0x2a   :  { %66 = vst [vmem:[#allocation4] sm:$0x3] %v339_v0  ;;  %v70_v5 = vmul.f32 0.5, %v68_v2  ;;  %v199_v6 = vunpack.c.l.bf16 %v198_v3  ;;  %v200_v7 = vunpack.c.h.bf16 %v198_v3  ;;  %s340_s1 = smov [#allocation11]   ;;  %s341_s17 = smov [#allocation13]  }
  0x2b   :  { %211 = vtanh.f32 %v69_v4  ;;  %s166_s16 = sshll.u32 %s340_s1, 4  ;;  %s176_s18 = sshll.u32 %s341_s17, 4  ;;  %s167_s16 = int_to_ptr.vmem [resolvable:$true] %s166_s16  ;;  %s395_s18 = int_to_ptr.vmem [resolvable:$true] %s176_s18 }
  0x2c   :  { %v123_v8 = vrot.slane %v199_v6, 4  ;;  %v129_v9 = vrot.slane %v200_v7, 4  ;;  %213 = vtanh.f32 %v70_v5  ;;  %s342_s19 = smov [#allocation10]   ;;  %s259_s21 = scalar_lea.vmem %s167_s16, 32 }
  0x2d   :  { %s156_s20 = sshll.u32 %s342_s19, 4  ;;  %p260_p2 = scmp.ne.s32.totalorder %s167_s16, %s259_s21  ;;  %s397_s20 = int_to_ptr.vmem [resolvable:$true] %s156_s20 }
  0x2e   :  { %v124_v10 = vadd.f32 %v199_v6, %v123_v8  ;;  %v130_v11 = vadd.f32 %v200_v7, %v129_v9  ;;  %p264_p3 = scmp.lt.s32.totalorder %s167_s16, %s167_s16  ;;  %p265_p4 = scmp.lt.s32.totalorder %s259_s21, %s259_s21 }
  0x30   :  { %v125_v12 = vrot.slane %v124_v10, 2  ;;  %v131_v13 = vrot.slane %v130_v11, 2  ;;  %v103_v52 = vld [vmem:[#allocation3] sm:$0x3]  ;;  %v81_v57 = vld [vmem:[#allocation2] sm:$0x3]  ;;  %p266_p5 = por %p265_p4, %p264_p3 }
  0x31   :  { %v122_v19 = vld [vmem:[#allocation4] sm:$0x3] }
  0x32   :  { %v126_v14 = vadd.f32 %v125_v12, %v124_v10  ;;  %v132_v15 = vadd.f32 %v131_v13, %v130_v11  ;;  %p267_p6 = pnand %p266_p5, %p260_p2 }
  0x34   :  { %v127_v16 = vrot.slane %v126_v14, 1  ;;  %v133_v17 = vrot.slane %v132_v15, 1 }
  0x35   :  { %v212_v18 = vpop.eup %211 }
  0x36   :  { %v128_v20 = vadd.f32 %v127_v16, %v126_v14  ;;  %v134_v21 = vadd.f32 %v133_v17, %v132_v15  ;;  %v214_v22 = vpop.eup %213  ;;  %v73_v23 = vadd.f32 1.0, %v212_v18 }
  0x37   :  { %v74_v24 = vadd.f32 1.0, %v214_v22 }
  0x38   :  { %v137_v25 = vsel %vm98_vm0, %v134_v21, %v128_v20  ;;  %v75_v26 = vmul.f32 0.5, %v73_v23 }
  0x39   :  { %v139_v27 = vadd.f32 %v137_v25, %v122_v19  ;;  %v76_v28 = vmul.f32 0.5, %v74_v24 }
  0x3a   :  { %v104_v29 = vrot.slane %v75_v26, 4  ;;  %v82_v30 = vmul.f32 %v199_v6, %v75_v26 }
  0x3b   :  { %140 = vst [vmem:[#allocation4] sm:$0x3] %v139_v27  ;;  %v110_v31 = vrot.slane %v76_v28, 4  ;;  %v83_v32 = vmul.f32 %v200_v7, %v76_v28 }
  0x3c   :  { %v105_v33 = vadd.f32 %v104_v29, %v75_v26  ;;  %v84_v34 = vrot.slane %v82_v30, 4 }
  0x3d   :  { %v111_v35 = vadd.f32 %v110_v31, %v76_v28  ;;  %v90_v36 = vrot.slane %v83_v32, 4 }
  0x3e   :  { %v106_v37 = vrot.slane %v105_v33, 2  ;;  %v85_v38 = vadd.f32 %v84_v34, %v82_v30 }
  0x3f   :  { %v112_v39 = vrot.slane %v111_v35, 2  ;;  %v91_v40 = vadd.f32 %v90_v36, %v83_v32 }
  0x40   :  { %v107_v41 = vadd.f32 %v106_v37, %v105_v33  ;;  %v86_v42 = vrot.slane %v85_v38, 2 }
  0x41   :  { %v113_v43 = vadd.f32 %v112_v39, %v111_v35  ;;  %v92_v44 = vrot.slane %v91_v40, 2 }
  0x42   :  { %v148_v45 = vld [vmem:[#allocation4] sm:$0x3]  ;;  %v108_v46 = vrot.slane %v107_v41, 1  ;;  %v87_v47 = vadd.f32 %v86_v42, %v85_v38 }
  0x43   :  { %149 = vst [vmem:[#allocation13] sm:$0x3] %v148_v45  ;;  %v114_v48 = vrot.slane %v113_v43, 1  ;;  %v93_v49 = vadd.f32 %v92_v44, %v91_v40 }
  0x44   :  { %v109_v50 = vadd.f32 %v108_v46, %v107_v41  ;;  %v88_v51 = vrot.slane %v87_v47, 1 }
  0x45   :  { %v115_v53 = vadd.f32 %v114_v48, %v113_v43  ;;  %v94_v54 = vrot.slane %v93_v49, 1 }
  0x46   :  { %v89_v55 = vadd.f32 %v88_v51, %v87_v47 }
  0x47   :  { %v118_v56 = vsel %vm98_vm0, %v115_v53, %v109_v50  ;;  %v95_v58 = vadd.f32 %v94_v54, %v93_v49 }
  0x48   :  { %v120_v59 = vadd.f32 %v118_v56, %v103_v52 }
  0x49   :  { %v99_v60 = vsel %vm98_vm0, %v95_v58, %v89_v55 }
  0x4a   :  { %121 = vst [vmem:[#allocation3] sm:$0x3] %v120_v59  ;;  %v101_v61 = vadd.f32 %v99_v60, %v81_v57 }
  0x4c   :  { %102 = vst [vmem:[#allocation2] sm:$0x3] %v101_v61 }
  0x51   :  { %v146_v62 = vld [vmem:[#allocation3] sm:$0x3] }
  0x52   :  { %147 = vst [vmem:[#allocation11] sm:$0x3] %v146_v62 }
  0x53   :  { %v144_v63 = vld [vmem:[#allocation2] sm:$0x3] }
  0x54   :  { %270 = shalt.err (!%p267_p6)
}
  0x55   :  { %s271_s24 = scalar_lea.hbm %s448_s3, 32 }
  0x56   :  { %p272_p7 = scmp.ne.s32.totalorder %s448_s3, %s271_s24  ;;  %p275_p8 = scmp.lt.u32.totalorder %s271_s24, %s448_s3 }
  0x58   :  { %p277_p9 = pnand %p275_p8, %p272_p7 }
  0x5a   :  { %280 = shalt.err (!%p277_p9)
}
  0x5b   :  { %169 = dma.vmem_to_hbm [thread:$0]  %s167_s16, 32, %s448_s3, [#allocation12]   ;;  %145 = vst [vmem:[#allocation10] sm:$0x3] %v144_v63 }
  0x5c   :  { %s281_s5 = scalar_lea.vmem %s395_s18, 32  ;;  %p286_p11 = scmp.lt.s32.totalorder %s395_s18, %s395_s18 }
  0x5d   :  { %p282_p10 = scmp.ne.s32.totalorder %s395_s18, %s281_s5  ;;  %p287_p12 = scmp.lt.s32.totalorder %s281_s5, %s281_s5 }
  0x5f   :  { %p288_p13 = por %p287_p12, %p286_p11 }
  0x61   :  { %p289_p0 = pnand %p288_p13, %p282_p10 }
  0x63   :  { %292 = shalt.err (!%p289_p0)
}
  0x64   :  { %s293_s8 = scalar_lea.hbm %s449_s4, 32 }
  0x65   :  { %p294_p1 = scmp.ne.s32.totalorder %s449_s4, %s293_s8  ;;  %p297_p2 = scmp.lt.u32.totalorder %s293_s8, %s449_s4 }
  0x67   :  { %p299_p3 = pnand %p297_p2, %p294_p1 }
  0x69   :  { %302 = shalt.err (!%p299_p3)
}
  0x6a   :  { %179 = dma.vmem_to_hbm [thread:$0]  %s395_s18, 32, %s449_s4, [#allocation12]  }
  0x6b   :  { %s303_s13 = scalar_lea.vmem %s397_s20, 32  ;;  %p308_p5 = scmp.lt.s32.totalorder %s397_s20, %s397_s20 }
  0x6c   :  { %p304_p4 = scmp.ne.s32.totalorder %s397_s20, %s303_s13  ;;  %p309_p6 = scmp.lt.s32.totalorder %s303_s13, %s303_s13 }
  0x6e   :  { %p310_p7 = por %p309_p6, %p308_p5 }
  0x70   :  { %p311_p8 = pnand %p310_p7, %p304_p4 }
  0x72   :  { %314 = shalt.err (!%p311_p8)
}
  0x73   :  { %s315_s1 = scalar_lea.hbm %s447_s2, 32 }
  0x74   :  { %p316_p9 = scmp.ne.s32.totalorder %s447_s2, %s315_s1  ;;  %p319_p10 = scmp.lt.u32.totalorder %s315_s1, %s447_s2 }
  0x76   :  { %p321_p11 = pnand %p319_p10, %p316_p9 }
  0x78   :  { %324 = shalt.err (!%p321_p11)
}
  0x79   :  { %159 = dma.vmem_to_hbm [thread:$0]  %s397_s20, 32, %s447_s2, [#allocation7]  }
  0x7a   :  { %329 = dma.done.wait [#allocation7], 32  }
  0x7b   :  { %330 = vsyncadd [#allocation7], 4294967264 }
  0x7c   :  { %331 = dma.done.wait [#allocation12], 64  }
  0x7d   :  { %332 = vsyncadd [#allocation12], 4294967232 }
  0x7e   :  { %189 = vsyncpa [#allocation6], 1 }
  0x7f   :  { %190 = vsyncpa [#allocation9], 1 }
  0x80   :  { %191 = vsyncpa [#allocation7], 1 }
  0x81   :  { %192 = vsyncpa [#allocation12], 1 }

</bundles_post_ra>
